<compile_context>
chip_gen: v6e
topology: v6e:2x2x1
jax: 0.10.0
libtpu: 0.0.40
codegen_flags: <defaults>
</compile_context>

<pallas_src>
import jax
import jax.numpy as jnp
from jax.experimental import pallas as pl
from jax.experimental.pallas import tpu as pltpu


def _round_up(x, m):
    return (x + m - 1) // m * m


def _default_tiles():
    """Generation-tuned (TM, TN, TK) targets; always clamped to the problem."""
    try:
        kind = jax.devices()[0].device_kind.lower()
    except Exception:
        kind = ""
    if "v6" in kind:          # v6e: highest compute/BW ratio -> biggest tiles
        return 1024, 1024, 512
    if "7" in kind:           # v7x: 64 MiB VMEM -> slightly smaller tiles
        return 768, 768, 512
    return 512, 512, 512      # v5e / unknown: ~256 f/B > v5e ridge (~240 f/B)


def _make_kernel(*, single_k, apply_dropout, use_prng, inv_keep,
                 keep_threshold, tile_shape):
    """Build the fused (matmul + bias + ReLU + dropout) kernel body."""

    def epilogue(acc, b_ref, bits_ref, seed_ref):
        z = jnp.maximum(acc + b_ref[...], 0.0)              # bias + ReLU (f32)
        if apply_dropout:
            if use_prng:
                # Independent stream per output tile: mix the call seed with
                # the (i, j) tile coordinates.
                pltpu.prng_seed(seed_ref[0], pl.program_id(0), pl.program_id(1))
                bits = pltpu.prng_random_bits(tile_shape)
                if bits.dtype != jnp.uint32:
                    bits = pltpu.bitcast(bits, jnp.uint32)
            else:
                bits = bits_ref[...]
            # keep iff bits < keep_prob * 2^32.  Threshold is clamped to
            # 2^32 - 1, biasing keep probability by ~2^-32 (negligible).
            keep = bits < jnp.uint32(keep_threshold)
            z = jnp.where(keep, z * jnp.float32(inv_keep), jnp.float32(0.0))
        return z

    if single_k:
        # Whole K panel fits one tile: no reduction grid axis, no accumulator
        # scratch round-trip, epilogue runs unconditionally.
        def kernel(seed_ref, x_ref, w_ref, b_ref, *rest):
            if apply_dropout and not use_prng:
                bits_ref, o_ref = rest
            else:
                bits_ref = None
                (o_ref,) = rest
            acc = jnp.dot(x_ref[...], w_ref[...],
                          preferred_element_type=jnp.float32)
            o_ref[...] = epilogue(acc, b_ref, bits_ref, seed_ref).astype(o_ref.dtype)
        return kernel

    def kernel(seed_ref, x_ref, w_ref, b_ref, *rest):
        if apply_dropout and not use_prng:
            bits_ref, o_ref, acc_ref = rest
        else:
            bits_ref = None
            o_ref, acc_ref = rest
        k = pl.program_id(2)

        @pl.when(k == 0)
        def _():
            acc_ref[...] = jnp.zeros_like(acc_ref)

        # (TM, TK) x (TK, TN) -> (TM, TN): weight is already in (K, N) layout,
        # so this is a native MXU matmul (no per-step RHS transpose).
        acc_ref[...] += jnp.dot(x_ref[...], w_ref[...],
                                preferred_element_type=jnp.float32)

        @pl.when(k == pl.num_programs(2) - 1)
        def _():
            o_ref[...] = epilogue(acc_ref[...], b_ref, bits_ref,
                                  seed_ref).astype(o_ref.dtype)

    return kernel


def _linear_block_call(x, w_t, b_row, *, Kp, TK, TN, tm, p, seed, training,
                       compute_dtype, out_dtype, dropout_impl):
    B, IN = x.shape
    OUT = b_row.shape[1]
    out_dtype = out_dtype or x.dtype

    apply_dropout = bool(training and p > 0.0)
    keep_prob = 1.0 - float(p)
    use_prng = dropout_impl == "prng"
    keep_threshold = min(int(round(keep_prob * 2.0 ** 32)), 2 ** 32 - 1)
    inv_keep = (1.0 / keep_prob) if keep_prob > 0.0 else 0.0

    TM = min(tm, _round_up(B, 8))
    grid_m = pl.cdiv(B, TM)
    grid_n = pl.cdiv(OUT, TN)
    grid_k = Kp // TK
    single_k = grid_k == 1

    # Only the contraction (K) dim needs zero padding for correctness; M/N
    # boundary blocks are masked by Pallas, so no trailing output slice.
    x_c = x.astype(compute_dtype)
    if Kp != IN:
        x_c = jnp.pad(x_c, ((0, 0), (0, Kp - IN)))

    seed_arr = jnp.asarray(seed, dtype=jnp.int32).reshape((1,))

    if single_k:
        x_idx = lambda i, j, s: (i, 0)
        w_idx = lambda i, j, s: (0, j)
        b_idx = lambda i, j, s: (0, j)
        o_idx = lambda i, j, s: (i, j)
        grid = (grid_m, grid_n)
        dims = ("parallel", "parallel")
        scratch = []
    else:
        x_idx = lambda i, j, k, s: (i, k)
        w_idx = lambda i, j, k, s: (k, j)
        b_idx = lambda i, j, k, s: (0, j)
        o_idx = lambda i, j, k, s: (i, j)
        grid = (grid_m, grid_n, grid_k)
        dims = ("parallel", "parallel", "arbitrary")
        scratch = [pltpu.VMEM((TM, TN), jnp.float32)]

    # TODO(synk): add pipeline_mode=pl.Buffered(3) on the x/w specs if xprof
    # still shows exposed DMA in the k-loop after the larger tiles.
    in_specs = [
        pl.BlockSpec((TM, TK), x_idx),   # x tile (compute_dtype)
        pl.BlockSpec((TK, TN), w_idx),   # weight tile, already (K, N)
        pl.BlockSpec((1, TN), b_idx),    # bias row (f32)
    ]
    args = [x_c, w_t, b_row]

    if apply_dropout and not use_prng:
        # Host-bits fallback (interpret mode / emulator only).
        bits = jax.random.bits(jax.random.PRNGKey(int(seed)), (B, OUT), jnp.uint32)
        in_specs.append(pl.BlockSpec((TM, TN), o_idx))
        args.append(bits)

    kernel = _make_kernel(
        single_k=single_k, apply_dropout=apply_dropout, use_prng=use_prng,
        inv_keep=inv_keep, keep_threshold=keep_threshold, tile_shape=(TM, TN))

    c_item = jnp.dtype(compute_dtype).itemsize
    o_item = jnp.dtype(out_dtype).itemsize
    flops = 2 * B * OUT * Kp
    bytes_accessed = (B * Kp * c_item * grid_n        # x re-read once per N tile
                      + Kp * OUT * c_item * grid_m    # w re-read once per M tile
                      + OUT * 4 * grid_m              # bias
                      + B * OUT * o_item)             # output write
    if apply_dropout and not use_prng:
        bytes_accessed += B * OUT * 4

    vmem_needed = (2 * TM * TK * c_item + 2 * TK * TN * c_item   # double-buffered x, w
                   + 2 * TM * TN * o_item + 2 * TN * 4           # output, bias
                   + (0 if single_k else TM * TN * 4))           # f32 accumulator
    if apply_dropout and not use_prng:
        vmem_needed += 2 * TM * TN * 4
    vmem_limit = int(min(max(int(vmem_needed * 1.3) + (4 << 20), 32 << 20),
                         96 << 20))

    return pl.pallas_call(
        kernel,
        out_shape=jax.ShapeDtypeStruct((B, OUT), out_dtype),
        grid_spec=pltpu.PrefetchScalarGridSpec(
            num_scalar_prefetch=1,
            grid=grid,
            in_specs=in_specs,
            out_specs=pl.BlockSpec((TM, TN), o_idx),
            scratch_shapes=scratch,
        ),
        compiler_params=pltpu.CompilerParams(
            dimension_semantics=dims,
            vmem_limit_bytes=vmem_limit),
        cost_estimate=pl.CostEstimate(flops=flops, transcendentals=0,
                                      bytes_accessed=bytes_accessed),
    )(seed_arr, *args)


def make_linear_block(weight, bias, *, p=0.5, compute_dtype=jnp.bfloat16,
                      out_dtype=None, dropout_impl="prng",
                      tm=None, tn=None, tk=None):
    """Prepare parameters once and return apply(x, seed=0, training=True).

    weight: (OUT, IN) float (PyTorch nn.Linear layout), bias: (OUT,).
    The weight is transposed to (IN, OUT), cast to compute_dtype and zero
    padded along K exactly once, amortized across all calls.
    NOTE: vary `seed` per training step for fresh dropout masks.
    """
    OUT, IN = weight.shape
    assert bias.shape == (OUT,)
    dtm, dtn, dtk = _default_tiles()
    tm = tm or dtm
    tn = tn or dtn
    tk = tk or dtk

    TN = min(tn, _round_up(OUT, 128))
    TK = min(tk, _round_up(IN, 128))
    Kp = _round_up(IN, TK)

    w_t = jnp.pad(weight.T.astype(compute_dtype), ((0, Kp - IN), (0, 0)))
    b_row = bias.astype(jnp.float32).reshape(1, OUT)

    def apply(x, *, seed=0, training=True):
        return _linear_block_call(
            x, w_t, b_row, Kp=Kp, TK=TK, TN=TN, tm=tm, p=p, seed=seed,
            training=training, compute_dtype=compute_dtype,
            out_dtype=out_dtype, dropout_impl=dropout_impl)

    return apply


def linear_block(x, weight, bias, *, seed=0, training=True, **kwargs):
    """One-shot convenience wrapper (prefer make_linear_block for reuse)."""
    return make_linear_block(weight, bias, **kwargs)(x, seed=seed,
                                                     training=training)


if __name__ == "__main__":
    # Small shapes consistent with the module: batch=8, in=32, out=64.
    B, IN, OUT = 8, 32, 64
    key = jax.random.PRNGKey(0)
    kx, kw, kb = jax.random.split(key, 3)

    x = jax.random.normal(kx, (B, IN), dtype=jnp.float32)
    bound = 1.0 / (IN ** 0.5)
    weight = jax.random.uniform(kw, (OUT, IN), jnp.float32, -bound, bound)
    bias = jax.random.uniform(kb, (OUT,), jnp.float32, -bound, bound)

    # Reference with matching bf16 operand rounding (f32 accumulation).
    xb = x.astype(jnp.bfloat16).astype(jnp.float32)
    wb = weight.astype(jnp.bfloat16).astype(jnp.float32)
    ref = jnp.maximum(xb @ wb.T + bias, 0.0)

    block = make_linear_block(weight, bias, p=0.5)

    # Training-mode run: in-kernel TPU PRNG by default; fall back to
    # host-provided bits if the hardware PRNG path is unavailable.
    try:
        out = block(x, seed=0, training=True)
        jax.block_until_ready(out)
    except Exception:
        block = make_linear_block(weight, bias, p=0.5, dropout_impl="bits")
        out = block(x, seed=0, training=True)
        jax.block_until_ready(out)

    assert out.shape == (B, OUT)
    # Kept elements must equal relu(linear(x)) * 2 (scale 1/(1-0.5)).
    kept = out != 0.0
    assert jnp.allclose(jnp.where(kept, out.astype(jnp.float32), 0.0),
                        jnp.where(kept, ref * 2.0, 0.0),
                        atol=5e-3, rtol=5e-3)
    # Dropout must actually drop something (p=0.5 over 512 elements).
    assert int(jnp.sum(out == 0.0)) > int(jnp.sum(ref == 0.0))

    # Eval-mode run (no dropout) must match the deterministic reference.
    out_eval = block(x, training=False)
    jax.block_until_ready(out_eval)
    assert jnp.allclose(out_eval, ref, atol=5e-3, rtol=5e-3)

    # Exercise the multi-k (reduction grid) path with K zero-padding and
    # unpadded M/N boundary blocks.
    B2, IN2, OUT2 = 16, 640, 192
    k2 = jax.random.PRNGKey(1)
    ka, kw2, kb2 = jax.random.split(k2, 3)
    x2 = jax.random.normal(ka, (B2, IN2), dtype=jnp.float32)
    w2 = jax.random.normal(kw2, (OUT2, IN2), dtype=jnp.float32) * 0.05
    b2 = jax.random.normal(kb2, (OUT2,), dtype=jnp.float32)

    block2 = make_linear_block(w2, b2, p=0.5, tk=512)   # Kp=1024 -> 2 k-steps
    out2 = block2(x2, training=False)
    jax.block_until_ready(out2)
    ref2 = jnp.maximum(
        x2.astype(jnp.bfloat16).astype(jnp.float32)
        @ w2.astype(jnp.bfloat16).astype(jnp.float32).T + b2, 0.0)
    assert out2.shape == (B2, OUT2)
    assert jnp.allclose(out2, ref2, atol=2e-2, rtol=2e-2)

    print("KERNEL_OK")
</pallas_src>

<mosaic_0001>
module attributes {stable_mosaic.version = 11 : i64} {
  func.func @kernel(%arg0: i32, %arg1: i32, %arg2: memref<1xi32, #tpu.memory_space<smem>>, %arg3: memref<8x128xbf16, #tpu.memory_space<vmem>>, %arg4: memref<128x128xbf16, #tpu.memory_space<vmem>>, %arg5: memref<1x128xf32, #tpu.memory_space<vmem>>, %arg6: memref<8x128xf32, #tpu.memory_space<vmem>>) attributes {dimension_semantics = [#tpu.dimension_semantics<parallel>, #tpu.dimension_semantics<parallel>], iteration_bounds = array<i64: 1, 1>, scalar_prefetch = 1 : i64, scratch_operands = 0 : i64, tpu.core_type = #tpu.core_type<tc>, window_params = [{transform_indices = @transform_0, window_bounds = array<i64: 8, 128>}, {transform_indices = @transform_1, window_bounds = array<i64: 128, 128>}, {transform_indices = @transform_2, window_bounds = array<i64: 1, 128>}, {transform_indices = @transform_3, window_bounds = array<i64: 8, 128>}]} {
    %c0 = arith.constant 0 : index
    %c0_0 = arith.constant 0 : index
    %0 = vector.load %arg3[%c0, %c0_0] : memref<8x128xbf16, #tpu.memory_space<vmem>>, vector<8x128xbf16>
    %c0_1 = arith.constant 0 : index
    %c0_2 = arith.constant 0 : index
    %1 = vector.load %arg4[%c0_1, %c0_2] : memref<128x128xbf16, #tpu.memory_space<vmem>>, vector<128x128xbf16>
    %cst = arith.constant dense<0.000000e+00> : vector<8x128xf32>
    %2 = tpu.matmul %0, %1, %cst {dimension_numbers = #tpu.dot_dimension_numbers<[1], [0], [0], [1], [0, 0, 1, 1], [], []>} : vector<8x128xbf16>, vector<128x128xbf16>, vector<8x128xf32> -> vector<8x128xf32>
    %c0_3 = arith.constant 0 : index
    %c0_4 = arith.constant 0 : index
    %3 = vector.load %arg5[%c0_3, %c0_4] : memref<1x128xf32, #tpu.memory_space<vmem>>, vector<1x128xf32>
    %4 = vector.broadcast %3 : vector<1x128xf32> to vector<8x128xf32>
    %5 = arith.addf %2, %4 : vector<8x128xf32>
    %cst_5 = arith.constant 0.000000e+00 : f32
    %6 = vector.broadcast %cst_5 : f32 to vector<8x128xf32>
    %7 = arith.maximumf %5, %6 : vector<8x128xf32>
    %c0_6 = arith.constant 0 : index
    %8 = memref.load %arg2[%c0_6] : memref<1xi32, #tpu.memory_space<smem>>
    "tpu.prng_set_seed_32"(%8, %arg0, %arg1) : (i32, i32, i32) -> ()
    %9 = "tpu.prng_random_bits"() : () -> vector<8x128xi32>
    %10 = tpu.bitcast %9 : vector<8x128xi32> -> vector<8x128xi32>
    %c-2147483648_i32 = arith.constant -2147483648 : i32
    %11 = vector.broadcast %c-2147483648_i32 : i32 to vector<8x128xi32>
    %12 = arith.cmpi ult, %10, %11 : vector<8x128xi32>
    %cst_7 = arith.constant 2.000000e+00 : f32
    %13 = vector.broadcast %cst_7 : f32 to vector<8x128xf32>
    %14 = arith.mulf %7, %13 : vector<8x128xf32>
    %cst_8 = arith.constant 0.000000e+00 : f32
    %15 = vector.broadcast %cst_8 : f32 to vector<8x128xf32>
    %16 = arith.select %12, %14, %15 : vector<8x128xi1>, vector<8x128xf32>
    %c0_9 = arith.constant 0 : index
    %c0_10 = arith.constant 0 : index
    %17 = vector.load %arg6[%c0_9, %c0_10] : memref<8x128xf32, #tpu.memory_space<vmem>>, vector<8x128xf32>
    tpu.vector_store %arg6[%c0_9, %c0_10], %16 {strides = array<i32>} : memref<8x128xf32, #tpu.memory_space<vmem>>, vector<8x128xf32>,
    return
  }
  func.func @transform_0(%arg0: i32, %arg1: i32, %arg2: memref<1xi32, #tpu.memory_space<smem>>) -> (i32, i32) {
    %c0_i32 = arith.constant 0 : i32
    %c0_i32_0 = arith.constant 0 : i32
    return %arg0, %c0_i32 : i32, i32
  }
  func.func @transform_1(%arg0: i32, %arg1: i32, %arg2: memref<1xi32, #tpu.memory_space<smem>>) -> (i32, i32) {
    %c0_i32 = arith.constant 0 : i32
    %c0_i32_0 = arith.constant 0 : i32
    return %c0_i32, %arg1 : i32, i32
  }
  func.func @transform_2(%arg0: i32, %arg1: i32, %arg2: memref<1xi32, #tpu.memory_space<smem>>) -> (i32, i32) {
    %c0_i32 = arith.constant 0 : i32
    %c0_i32_0 = arith.constant 0 : i32
    return %c0_i32, %arg1 : i32, i32
  }
  func.func @transform_3(%arg0: i32, %arg1: i32, %arg2: memref<1xi32, #tpu.memory_space<smem>>) -> (i32, i32) {
    %c0_i32 = arith.constant 0 : i32
    return %arg0, %arg1 : i32, i32
  }
}

module attributes {stable_mosaic.version = 11 : i64} {
  func.func @kernel(%arg0: i32, %arg1: i32, %arg2: memref<1xi32, #tpu.memory_space<smem>>, %arg3: memref<8x128xbf16, #tpu.memory_space<vmem>>, %arg4: memref<128x128xbf16, #tpu.memory_space<vmem>>, %arg5: memref<1x128xf32, #tpu.memory_space<vmem>>, %arg6: memref<8x128xi32, #tpu.memory_space<vmem>>, %arg7: memref<8x128xf32, #tpu.memory_space<vmem>>) attributes {dimension_semantics = [#tpu.dimension_semantics<parallel>, #tpu.dimension_semantics<parallel>], iteration_bounds = array<i64: 1, 1>, scalar_prefetch = 1 : i64, scratch_operands = 0 : i64, tpu.core_type = #tpu.core_type<tc>, window_params = [{transform_indices = @transform_0, window_bounds = array<i64: 8, 128>}, {transform_indices = @transform_1, window_bounds = array<i64: 128, 128>}, {transform_indices = @transform_2, window_bounds = array<i64: 1, 128>}, {transform_indices = @transform_3, window_bounds = array<i64: 8, 128>}, {transform_indices = @transform_4, window_bounds = array<i64: 8, 128>}]} {
    %c0 = arith.constant 0 : index
    %c0_0 = arith.constant 0 : index
    %0 = vector.load %arg3[%c0, %c0_0] : memref<8x128xbf16, #tpu.memory_space<vmem>>, vector<8x128xbf16>
    %c0_1 = arith.constant 0 : index
    %c0_2 = arith.constant 0 : index
    %1 = vector.load %arg4[%c0_1, %c0_2] : memref<128x128xbf16, #tpu.memory_space<vmem>>, vector<128x128xbf16>
    %cst = arith.constant dense<0.000000e+00> : vector<8x128xf32>
    %2 = tpu.matmul %0, %1, %cst {dimension_numbers = #tpu.dot_dimension_numbers<[1], [0], [0], [1], [0, 0, 1, 1], [], []>} : vector<8x128xbf16>, vector<128x128xbf16>, vector<8x128xf32> -> vector<8x128xf32>
    %c0_3 = arith.constant 0 : index
    %c0_4 = arith.constant 0 : index
    %3 = vector.load %arg5[%c0_3, %c0_4] : memref<1x128xf32, #tpu.memory_space<vmem>>, vector<1x128xf32>
    %4 = vector.broadcast %3 : vector<1x128xf32> to vector<8x128xf32>
    %5 = arith.addf %2, %4 : vector<8x128xf32>
    %cst_5 = arith.constant 0.000000e+00 : f32
    %6 = vector.broadcast %cst_5 : f32 to vector<8x128xf32>
    %7 = arith.maximumf %5, %6 : vector<8x128xf32>
    %c0_6 = arith.constant 0 : index
    %c0_7 = arith.constant 0 : index
    %8 = vector.load %arg6[%c0_6, %c0_7] : memref<8x128xi32, #tpu.memory_space<vmem>>, vector<8x128xi32>
    %c-2147483648_i32 = arith.constant -2147483648 : i32
    %9 = vector.broadcast %c-2147483648_i32 : i32 to vector<8x128xi32>
    %10 = arith.cmpi ult, %8, %9 : vector<8x128xi32>
    %cst_8 = arith.constant 2.000000e+00 : f32
    %11 = vector.broadcast %cst_8 : f32 to vector<8x128xf32>
    %12 = arith.mulf %7, %11 : vector<8x128xf32>
    %cst_9 = arith.constant 0.000000e+00 : f32
    %13 = vector.broadcast %cst_9 : f32 to vector<8x128xf32>
    %14 = arith.select %10, %12, %13 : vector<8x128xi1>, vector<8x128xf32>
    %c0_10 = arith.constant 0 : index
    %c0_11 = arith.constant 0 : index
    %15 = vector.load %arg7[%c0_10, %c0_11] : memref<8x128xf32, #tpu.memory_space<vmem>>, vector<8x128xf32>
    tpu.vector_store %arg7[%c0_10, %c0_11], %14 {strides = array<i32>} : memref<8x128xf32, #tpu.memory_space<vmem>>, vector<8x128xf32>,
    return
  }
  func.func @transform_0(%arg0: i32, %arg1: i32, %arg2: memref<1xi32, #tpu.memory_space<smem>>) -> (i32, i32) {
    %c0_i32 = arith.constant 0 : i32
    %c0_i32_0 = arith.constant 0 : i32
    return %arg0, %c0_i32 : i32, i32
  }
  func.func @transform_1(%arg0: i32, %arg1: i32, %arg2: memref<1xi32, #tpu.memory_space<smem>>) -> (i32, i32) {
    %c0_i32 = arith.constant 0 : i32
    %c0_i32_0 = arith.constant 0 : i32
    return %c0_i32, %arg1 : i32, i32
  }
  func.func @transform_2(%arg0: i32, %arg1: i32, %arg2: memref<1xi32, #tpu.memory_space<smem>>) -> (i32, i32) {
    %c0_i32 = arith.constant 0 : i32
    %c0_i32_0 = arith.constant 0 : i32
    return %c0_i32, %arg1 : i32, i32
  }
  func.func @transform_3(%arg0: i32, %arg1: i32, %arg2: memref<1xi32, #tpu.memory_space<smem>>) -> (i32, i32) {
    %c0_i32 = arith.constant 0 : i32
    return %arg0, %arg1 : i32, i32
  }
  func.func @transform_4(%arg0: i32, %arg1: i32, %arg2: memref<1xi32, #tpu.memory_space<smem>>) -> (i32, i32) {
    %c0_i32 = arith.constant 0 : i32
    return %arg0, %arg1 : i32, i32
  }
}

</mosaic_0001>

<bundles_post_ra>
// kernel: tpu_custom_call.1
= control target key start
LH: loop header
LB: loop body
LE: loop exit
PB: predicated region body
PF: predicated region fallthrough
CT: control target
= control target key end

     0   :  { %v224_v1 = vmov 0.0   ;;  %vm225_vm0 = vmmov 0   ;;  %s293_s0 = inlined_call_operand.<no memory space> [shape: s32[1], index: 0, kind: input, shape index: {}]   ;;  %s294_s1 = inlined_call_operand.vmem [shape: bf16[8,128], index: 1, kind: input, shape index: {}]   ;;  %s295_s2 = inlined_call_operand.vmem [shape: bf16[128,64], index: 2, kind: input, shape index: {}]   ;;  %s296_s3 = inlined_call_operand.vmem [shape: f32[1,64], index: 3, kind: input, shape index: {}]   ;;  %s297_s4 = inlined_call_operand.vmem [shape: u32[8,64], index: 4, kind: input, shape index: {}]   ;;  %s298_s5 = inlined_call_operand.hbm [shape: f32[8,64], index: 5, kind: output, shape index: {}]  }
   0x1   :  { %v194_v0 = vld [vmem:[%s295_s2 + $0x38] sm:$0xff]   ;;  %171 = vmatprep.subr.bf16.mxu0 %v224_v1  ;;  %v195_v2 = vld [vmem:[%s295_s2 + $0x30] sm:$0xff]   ;;  %187 = vmatprep.mubr.msk.bf16.mxu0 %vm225_vm0, %v224_v1  ;;  %v196_v3 = vld [vmem:[%s295_s2 + $0x28] sm:$0xff]  }
   0x2   :  { %172 = vmatpush3.bf16.msra.mxu0 %v194_v0 }
   0x3   :  { %173 = vmatprep.subr.bf16.mxu0 %v224_v1 }
   0x6   :  { %174 = vmatpush3.bf16.msra.mxu0 %v195_v2 }
   0x7   :  { %175 = vmatprep.subr.bf16.mxu0 %v224_v1 }
   0x8   :  { %11 = vsyncpa [#allocation5], 0  ;;  %v197_v4 = vld [vmem:[%s295_s2 + $0x20] sm:$0xff]   ;;  %v198_v5 = vld [vmem:[%s295_s2 + $0x18] sm:$0xff]  }
   0x9   :  { %v199_v6 = vld [vmem:[%s295_s2 + $0x10] sm:$0xff]   ;;  %v200_v7 = vld [vmem:[%s295_s2 + $0x8] sm:$0xff]   ;;  %v201_v8 = vld [vmem:[%s295_s2] sm:$0xff]   ;;  %s226_s2 = smov [#allocation4]  }
   0xa   :  { %176 = vmatpush3.bf16.msra.mxu0 %v196_v3  ;;  %v21_v9 = vld [vmem:[%s294_s1] sm:$0xf]  ;;  %s145_s14 = sshll.u32 %s226_s2, 4  ;;  %s146_s14 = int_to_ptr.vmem [resolvable:$true] %s145_s14 }
   0xb   :  { %177 = vmatprep.subr.bf16.mxu0 %v224_v1  ;;  %v153_v10 = vld [vmem:[%s296_s3] ss:$0 sm:$0xff]  ;;  %s202_s1 = scalar_lea.vmem %s146_s14, 128  ;;  %p207_p1 = scmp.lt.s32.totalorder %s146_s14, %s146_s14 }
   0xc   :  { %v134_v13 = vld [vmem:[%s297_s4] sm:$0xff]  ;;  %p203_p0 = scmp.ne.s32.totalorder %s146_s14, %s202_s1  ;;  %p208_p2 = scmp.lt.s32.totalorder %s202_s1, %s202_s1 }
   0xd   :  { %vm135_vm1 = vcmp.lt.u32.totalorder %v134_v13, 2147483648 }
   0xe   :  { %178 = vmatpush3.bf16.msra.mxu0 %v197_v4  ;;  %p209_p3 = por %p208_p2, %p207_p1 }
   0xf   :  { %179 = vmatprep.subr.bf16.mxu0 %v224_v1 }
  0x10   :  { %p210_p4 = pnand %p209_p3, %p203_p0 }
  0x12   :  { %180 = vmatpush3.bf16.msra.mxu0 %v198_v5 }
  0x13   :  { %181 = vmatprep.subr.bf16.mxu0 %v224_v1 }
  0x16   :  { %182 = vmatpush3.bf16.msra.mxu0 %v199_v6 }
  0x17   :  { %183 = vmatprep.subr.bf16.mxu0 %v224_v1 }
  0x1a   :  { %184 = vmatpush3.bf16.msra.mxu0 %v200_v7 }
  0x1b   :  { %185 = vmatprep.subr.bf16.mxu0 %v224_v1 }
  0x1e   :  { %186 = vmatpush3.bf16.msra.mxu0 %v201_v8 }
  0x21   :  { %188 = vmatmul.mubr.bf16.vlgmr.msra.gmra.mxu0 %v21_v9 }
  0xe1   :  { %v127_v11 = vpop.f32.mrf.mxu0 }
  0xe2   :  { %v128_v12 = vadd.f32 %v153_v10, %v127_v11 }
  0xe3   :  { %v189_v14 = vpop.f32.mrf.mxu0 }
  0xe4   :  { %v133_v15 = vmax.f32 %v128_v12, 0.0 }
  0xe5   :  { %v130_v16 = vpop.f32.mrf.mxu0 }
  0xe6   :  { %v136_v17 = vmul.f32 2.0, %v133_v15 }
  0xe7   :  { %v190_v18 = vpop.f32.mrf.mxu0 }
  0xe8   :  { %v137_v19 = vsel %vm135_vm1, %v136_v17, 0.0 }
  0xe9   :  { %138 = vst [vmem:[#allocation4] sm:$0xff] %v137_v19 }
  0xea   :  { %213 = shalt.err (!%p210_p4)
}
  0xeb   :  { %148 = dma.vmem_to_hbm [thread:$0]  %s146_s14, 128, %s298_s5, [#allocation5]  }
  0xec   :  { %222 = dma.done.wait [#allocation5], 128  }
  0xed   :  { %223 = vsyncadd [#allocation5], 4294967168 }
  0xee   :  { %152 = vsyncpa [#allocation5], 1 }

</bundles_post_ra>
